<compile_context>
chip_gen: v7x
topology: tpu7x:2x2x1
jax: 0.10.0
libtpu: 0.0.40
codegen_flags: <defaults>
</compile_context>

<pallas_src>
import functools

import jax
import jax.numpy as jnp
from jax import lax
from jax.experimental import pallas as pl
from jax.experimental.pallas import tpu as pltpu

EPS = 1e-5
NEG_SLOPE = 0.2
LANE = 128


def _round_up(n, m):
    return ((n + m - 1) // m) * m


def _make_kernel(e_total):
    inv_e = 1.0 / float(max(e_total, 1))

    def kernel(x_ref, w0_ref, bias_ref, g0_ref, be0_ref, wo_ref, bo_ref,
               o_ref, sum_ref, sqs_ref, scale_ref, shift_ref):
        p = pl.program_id(0)           # 0 = batch-stats pass, 1 = compute pass
        i = pl.program_id(1)           # E-tile index
        n_tiles = pl.num_programs(1)

        @pl.when(p == 0)
        def _stats_pass():
            @pl.when(i == 0)
            def _init():
                sum_ref[...] = jnp.zeros_like(sum_ref)
                sqs_ref[...] = jnp.zeros_like(sqs_ref)

            # Bias-free pre-activation: zero pad rows contribute exactly 0, so
            # no row masking is needed, and accumulating around the bias offset
            # avoids E[h^2] - mean^2 cancellation when the bias dominates.
            d = jnp.dot(x_ref[...], w0_ref[...],
                        preferred_element_type=jnp.float32)
            ones = jnp.ones((1, d.shape[0]), jnp.float32)
            sum_ref[...] += jnp.dot(ones, d, preferred_element_type=jnp.float32)
            sqs_ref[...] += jnp.dot(ones, d * d,
                                    preferred_element_type=jnp.float32)

            @pl.when(i == n_tiles - 1)
            def _finalize():
                mean_d = sum_ref[...] * inv_e
                var = jnp.maximum(sqs_ref[...] * inv_e - mean_d * mean_d, 0.0)
                scale = g0_ref[...] * lax.rsqrt(var + EPS)        # biased var
                scale_ref[...] = scale
                shift_ref[...] = be0_ref[...] - (mean_d + bias_ref[...]) * scale

        @pl.when(p == 1)
        def _compute_pass():
            h = (jnp.dot(x_ref[...], w0_ref[...],
                         preferred_element_type=jnp.float32) + bias_ref[...])
            hn = h * scale_ref[...] + shift_ref[...]          # fused BatchNorm
            a = jnp.where(hn > 0, hn, NEG_SLOPE * hn)         # leaky_relu(0.2)
            o_ref[...] = (jnp.dot(a, wo_ref[...],
                                  preferred_element_type=jnp.float32)
                          + bo_ref[...]).astype(o_ref.dtype)

    return kernel


@functools.partial(jax.jit,
                   static_argnames=("tile_e", "single_tile_rows", "out_dtype"))
def edge_model_forward(src, dest, edge_attr, u, params, *,
                       tile_e=2048, single_tile_rows=8192,
                       out_dtype=jnp.float32):
    """src, dest: (E, d_node); edge_attr: (E, d_edge); u: (1, d_glob).

    batch=None path of EdgeModel.forward (layer_sizes=[H, H],
    output_activation=False).
    """
    w0, b0, g0, be0, wo, bo = params
    E, d_node = src.shape
    d_edge = edge_attr.shape[1]
    d_x = d_edge + 2 * d_node
    H = w0.shape[1]
    d_out = wo.shape[1]
    HP = _round_up(H, LANE)          # lane-padded hidden width

    f32 = jnp.float32

    # One fused streamed operand matching torch.cat([edge_attr, dest, src], 1);
    # kept in the caller's dtype (bf16 inputs feed the MXU with f32 accumulate).
    xin = jnp.concatenate([edge_attr, dest, src], axis=1)

    w0 = w0.astype(f32)
    w0_x = w0[:d_x]                  # rows matching [edge_attr | dest | src]
    w0_u = w0[d_x:]                  # rows matching the broadcast globals
    bias_eff = b0.astype(f32) + u.astype(f32) @ w0_u      # (1, H) rank-1 fold

    def pad_cols(a, n):
        return jnp.pad(a.astype(f32), ((0, 0), (0, n - a.shape[1])))

    # Hidden-width padding: zero-padded gamma/beta keep padded columns exactly
    # 0 through BN, and W_out's zero-padded rows ignore them in the output dot.
    w0_x_p = pad_cols(w0_x, HP)
    bias_p = pad_cols(bias_eff, HP)
    g0_p = pad_cols(g0, HP)
    be0_p = pad_cols(be0, HP)
    wo_p = jnp.pad(wo.astype(f32), ((0, HP - H), (0, 0)))  # rows only: narrow out
    bo_p = bo.astype(f32)

    # E tiling (multiple of 8 sublanes).  In the single-tile regime the input
    # block index never changes across the two phases, so the streamed operand
    # is fetched from HBM exactly once.
    row8 = _round_up(max(E, 1), 8)
    TILE_E = _round_up(min(max(tile_e, 8), row8), 8)
    if row8 <= single_tile_rows:
        TILE_E = row8
    E_pad = _round_up(max(E, 1), TILE_E)
    n_tiles = E_pad // TILE_E
    single = n_tiles == 1

    if E_pad != E:
        xin = jnp.pad(xin, ((0, E_pad - E), (0, 0)))       # zero rows: 0 weight

    tile_map = lambda p, i: (i, 0)       # E-streamed operand (both phases)
    const_map = lambda p, i: (0, 0)      # resident weights / bias vectors
    out_map = lambda p, i: (i * p, 0)    # stays on block 0 during the stats pass

    x_spec_kw = {}
    if single and TILE_E >= 1024:
        # Resident regime: no double buffer needed for the single input block.
        x_spec_kw = dict(pipeline_mode=pl.Buffered(1))

    out_padded = pl.pallas_call(
        _make_kernel(E),
        out_shape=jax.ShapeDtypeStruct((E_pad, d_out), out_dtype),
        grid=(2, n_tiles),
        in_specs=[
            pl.BlockSpec((TILE_E, d_x), tile_map, **x_spec_kw),
            pl.BlockSpec((d_x, HP), const_map),
            pl.BlockSpec((1, HP), const_map),
            pl.BlockSpec((1, HP), const_map),
            pl.BlockSpec((1, HP), const_map),
            pl.BlockSpec((HP, d_out), const_map),
            pl.BlockSpec((1, d_out), const_map),
        ],
        out_specs=pl.BlockSpec((TILE_E, d_out), out_map),
        scratch_shapes=[pltpu.VMEM((1, HP), f32) for _ in range(4)],
        compiler_params=pltpu.CompilerParams(
            # Both axes sequential: BatchNorm statistics are a global reduction
            # over E that must complete before the compute phase.
            dimension_semantics=("arbitrary", "arbitrary"),
            # <= ~48 MiB keeps headroom under v7x's 64 MiB physical VMEM while
            # still allowing large resident tiles on v5e/v6e.
            vmem_limit_bytes=48 * 1024 * 1024,
        ),
    )(xin, w0_x_p, bias_p, g0_p, be0_p, wo_p, bo_p)

    return out_padded[:E]


def make_params(key, input_size, hidden, output_size):
    ks = jax.random.split(key, 6)
    # Kernels stored as (in, out) = W.T of the torch Linear layers.
    w0 = jax.random.uniform(ks[0], (input_size, hidden), jnp.float32, -0.3, 0.3)
    b0 = jax.random.uniform(ks[1], (1, hidden), jnp.float32, -0.1, 0.1)
    g0 = 1.0 + 0.05 * jax.random.normal(ks[2], (1, hidden), jnp.float32)
    be0 = 0.05 * jax.random.normal(ks[3], (1, hidden), jnp.float32)
    wo = jax.random.uniform(ks[4], (hidden, output_size), jnp.float32, -0.3, 0.3)
    bo = jax.random.uniform(ks[5], (1, output_size), jnp.float32, -0.1, 0.1)
    return (w0, b0, g0, be0, wo, bo)


def reference_forward(src, dest, edge_attr, u, params):
    w0, b0, g0, be0, wo, bo = params
    E = src.shape[0]
    u_rep = jnp.broadcast_to(u, (E, u.shape[1]))
    x = jnp.concatenate([edge_attr, dest, src, u_rep], axis=1)
    h = x @ w0 + b0
    mean = jnp.mean(h, axis=0, keepdims=True)
    var = jnp.mean((h - mean) ** 2, axis=0, keepdims=True)
    hn = (h - mean) / jnp.sqrt(var + EPS) * g0 + be0
    a = jnp.where(hn > 0, hn, NEG_SLOPE * hn)
    return a @ wo + bo


if __name__ == "__main__":
    E = 20          # number of edges (deliberately not a multiple of 8)
    d_edge = 6      # edge feature dim
    d_node = 8      # node feature dim (src / dest)
    d_glob = 5      # global feature dim (u)
    input_size = d_edge + 2 * d_node + d_glob   # 27
    hidden = 32     # layer_sizes = [32, 32]
    output_size = 16

    key = jax.random.PRNGKey(0)
    k_src, k_dst, k_edge, k_u, k_par = jax.random.split(key, 5)
    src = jax.random.normal(k_src, (E, d_node), jnp.float32)
    dest = jax.random.normal(k_dst, (E, d_node), jnp.float32)
    edge_attr = jax.random.normal(k_edge, (E, d_edge), jnp.float32)
    u = jax.random.normal(k_u, (1, d_glob), jnp.float32)
    params = make_params(k_par, input_size, hidden, output_size)

    ref = reference_forward(src, dest, edge_attr, u, params)

    # 1) Default path: single-tile resident regime, f32 output.
    out1 = jax.block_until_ready(edge_model_forward(src, dest, edge_attr, u, params))
    assert out1.shape == (E, output_size)
    assert jnp.allclose(out1, ref, atol=2e-4, rtol=2e-4), \
        float(jnp.max(jnp.abs(out1 - ref)))

    # 2) Forced multi-tile two-phase regime (3 E-tiles of 8 rows + row padding,
    #    exercises the unmasked stats accumulation across tiles).
    out2 = jax.block_until_ready(
        edge_model_forward(src, dest, edge_attr, u, params,
                           tile_e=8, single_tile_rows=0))
    assert jnp.allclose(out2, ref, atol=2e-4, rtol=2e-4), \
        float(jnp.max(jnp.abs(out2 - ref)))

    # 3) bf16 output path (store-side cast only; accumulation stays f32).
    out3 = jax.block_until_ready(
        edge_model_forward(src, dest, edge_attr, u, params,
                           out_dtype=jnp.bfloat16))
    assert out3.dtype == jnp.bfloat16
    assert jnp.allclose(out3.astype(jnp.float32), ref, atol=1e-1, rtol=5e-2)

    print("KERNEL_OK")
</pallas_src>

<mosaic_0001>
module attributes {stable_mosaic.version = 11 : i64} {
  func.func @kernel(%arg0: i32, %arg1: i32, %arg2: memref<24x22xf32, #tpu.memory_space<vmem>>, %arg3: memref<22x128xf32, #tpu.memory_space<vmem>>, %arg4: memref<1x128xf32, #tpu.memory_space<vmem>>, %arg5: memref<1x128xf32, #tpu.memory_space<vmem>>, %arg6: memref<1x128xf32, #tpu.memory_space<vmem>>, %arg7: memref<128x16xf32, #tpu.memory_space<vmem>>, %arg8: memref<1x16xf32, #tpu.memory_space<vmem>>, %arg9: memref<24x16xf32, #tpu.memory_space<vmem>>, %arg10: memref<1x128xf32, #tpu.memory_space<vmem>>, %arg11: memref<1x128xf32, #tpu.memory_space<vmem>>, %arg12: memref<1x128xf32, #tpu.memory_space<vmem>>, %arg13: memref<1x128xf32, #tpu.memory_space<vmem>>) attributes {dimension_semantics = [#tpu.dimension_semantics<arbitrary>, #tpu.dimension_semantics<arbitrary>], iteration_bounds = array<i64: 2, 1>, scalar_prefetch = 0 : i64, scratch_operands = 4 : i64, tpu.core_type = #tpu.core_type<tc>, window_params = [{transform_indices = @transform_0, window_bounds = array<i64: 24, 22>}, {pipeline_mode = #tpu.pipeline_mode<synchronous>, transform_indices = @transform_1, window_bounds = array<i64: 22, 128>}, {pipeline_mode = #tpu.pipeline_mode<synchronous>, transform_indices = @transform_2, window_bounds = array<i64: 1, 128>}, {pipeline_mode = #tpu.pipeline_mode<synchronous>, transform_indices = @transform_3, window_bounds = array<i64: 1, 128>}, {pipeline_mode = #tpu.pipeline_mode<synchronous>, transform_indices = @transform_4, window_bounds = array<i64: 1, 128>}, {pipeline_mode = #tpu.pipeline_mode<synchronous>, transform_indices = @transform_5, window_bounds = array<i64: 128, 16>}, {pipeline_mode = #tpu.pipeline_mode<synchronous>, transform_indices = @transform_6, window_bounds = array<i64: 1, 16>}, {transform_indices = @transform_7, window_bounds = array<i64: 24, 16>}]} {
    %c0_i32 = arith.constant 0 : i32
    %0 = arith.cmpi eq, %arg0, %c0_i32 : i32
    %1 = arith.extui %0 : i1 to i32
    %c0_i32_0 = arith.constant 0 : i32
    %2 = arith.cmpi ne, %1, %c0_i32_0 : i32
    scf.if %2 {
      %c0_i32_2 = arith.constant 0 : i32
      %6 = arith.cmpi eq, %arg1, %c0_i32_2 : i32
      %7 = arith.extui %6 : i1 to i32
      %c0_i32_3 = arith.constant 0 : i32
      %8 = arith.cmpi ne, %7, %c0_i32_3 : i32
      scf.if %8 {
        %cst_20 = arith.constant 0.000000e+00 : f32
        %25 = vector.broadcast %cst_20 : f32 to vector<1x128xf32>
        %c0_21 = arith.constant 0 : index
        %c0_22 = arith.constant 0 : index
        %26 = vector.load %arg10[%c0_21, %c0_22] : memref<1x128xf32, #tpu.memory_space<vmem>>, vector<1x128xf32>
        tpu.vector_store %arg10[%c0_21, %c0_22], %25 {strides = array<i32>} : memref<1x128xf32, #tpu.memory_space<vmem>>, vector<1x128xf32>,
        %cst_23 = arith.constant 0.000000e+00 : f32
        %27 = vector.broadcast %cst_23 : f32 to vector<1x128xf32>
        %c0_24 = arith.constant 0 : index
        %c0_25 = arith.constant 0 : index
        %28 = vector.load %arg11[%c0_24, %c0_25] : memref<1x128xf32, #tpu.memory_space<vmem>>, vector<1x128xf32>
        tpu.vector_store %arg11[%c0_24, %c0_25], %27 {strides = array<i32>} : memref<1x128xf32, #tpu.memory_space<vmem>>, vector<1x128xf32>,
      } else {
      }
      %c0 = arith.constant 0 : index
      %c0_4 = arith.constant 0 : index
      %9 = vector.load %arg2[%c0, %c0_4] : memref<24x22xf32, #tpu.memory_space<vmem>>, vector<24x22xf32>
      %c0_5 = arith.constant 0 : index
      %c0_6 = arith.constant 0 : index
      %10 = vector.load %arg3[%c0_5, %c0_6] : memref<22x128xf32, #tpu.memory_space<vmem>>, vector<22x128xf32>
      %cst = arith.constant dense<0.000000e+00> : vector<24x128xf32>
      %11 = tpu.matmul %9, %10, %cst {dimension_numbers = #tpu.dot_dimension_numbers<[1], [0], [0], [1], [0, 0, 1, 1], [], []>} : vector<24x22xf32>, vector<22x128xf32>, vector<24x128xf32> -> vector<24x128xf32>
      %cst_7 = arith.constant 1.000000e+00 : f32
      %12 = vector.broadcast %cst_7 : f32 to vector<1x24xf32>
      %c0_8 = arith.constant 0 : index
      %c0_9 = arith.constant 0 : index
      %13 = vector.load %arg10[%c0_8, %c0_9] : memref<1x128xf32, #tpu.memory_space<vmem>>, vector<1x128xf32>
      %cst_10 = arith.constant dense<0.000000e+00> : vector<1x128xf32>
      %14 = tpu.matmul %12, %11, %cst_10 {dimension_numbers = #tpu.dot_dimension_numbers<[1], [0], [0], [1], [0, 0, 1, 1], [], []>} : vector<1x24xf32>, vector<24x128xf32>, vector<1x128xf32> -> vector<1x128xf32>
      %15 = arith.addf %13, %14 : vector<1x128xf32>
      %c0_11 = arith.constant 0 : index
      %c0_12 = arith.constant 0 : index
      %16 = vector.load %arg10[%c0_11, %c0_12] : memref<1x128xf32, #tpu.memory_space<vmem>>, vector<1x128xf32>
      tpu.vector_store %arg10[%c0_11, %c0_12], %15 {strides = array<i32>} : memref<1x128xf32, #tpu.memory_space<vmem>>, vector<1x128xf32>,
      %c0_13 = arith.constant 0 : index
      %c0_14 = arith.constant 0 : index
      %17 = vector.load %arg11[%c0_13, %c0_14] : memref<1x128xf32, #tpu.memory_space<vmem>>, vector<1x128xf32>
      %18 = arith.mulf %11, %11 : vector<24x128xf32>
      %cst_15 = arith.constant dense<0.000000e+00> : vector<1x128xf32>
      %19 = tpu.matmul %12, %18, %cst_15 {dimension_numbers = #tpu.dot_dimension_numbers<[1], [0], [0], [1], [0, 0, 1, 1], [], []>} : vector<1x24xf32>, vector<24x128xf32>, vector<1x128xf32> -> vector<1x128xf32>
      %20 = arith.addf %17, %19 : vector<1x128xf32>
      %c0_16 = arith.constant 0 : index
      %c0_17 = arith.constant 0 : index
      %21 = vector.load %arg11[%c0_16, %c0_17] : memref<1x128xf32, #tpu.memory_space<vmem>>, vector<1x128xf32>
      tpu.vector_store %arg11[%c0_16, %c0_17], %20 {strides = array<i32>} : memref<1x128xf32, #tpu.memory_space<vmem>>, vector<1x128xf32>,
      %c0_i32_18 = arith.constant 0 : i32
      %22 = arith.cmpi eq, %arg1, %c0_i32_18 : i32
      %23 = arith.extui %22 : i1 to i32
      %c0_i32_19 = arith.constant 0 : i32
      %24 = arith.cmpi ne, %23, %c0_i32_19 : i32
      scf.if %24 {
        %c0_20 = arith.constant 0 : index
        %c0_21 = arith.constant 0 : index
        %25 = vector.load %arg10[%c0_20, %c0_21] : memref<1x128xf32, #tpu.memory_space<vmem>>, vector<1x128xf32>
        %cst_22 = arith.constant 5.000000e-02 : f32
        %26 = vector.broadcast %cst_22 : f32 to vector<1x128xf32>
        %27 = arith.mulf %25, %26 : vector<1x128xf32>
        %c0_23 = arith.constant 0 : index
        %c0_24 = arith.constant 0 : index
        %28 = vector.load %arg11[%c0_23, %c0_24] : memref<1x128xf32, #tpu.memory_space<vmem>>, vector<1x128xf32>
        %cst_25 = arith.constant 5.000000e-02 : f32
        %29 = vector.broadcast %cst_25 : f32 to vector<1x128xf32>
        %30 = arith.mulf %28, %29 : vector<1x128xf32>
        %31 = arith.mulf %27, %27 : vector<1x128xf32>
        %32 = arith.subf %30, %31 : vector<1x128xf32>
        %cst_26 = arith.constant 0.000000e+00 : f32
        %33 = vector.broadcast %cst_26 : f32 to vector<1x128xf32>
        %34 = arith.maximumf %32, %33 : vector<1x128xf32>
        %c0_27 = arith.constant 0 : index
        %c0_28 = arith.constant 0 : index
        %35 = vector.load %arg5[%c0_27, %c0_28] : memref<1x128xf32, #tpu.memory_space<vmem>>, vector<1x128xf32>
        %cst_29 = arith.constant 9.99999974E-6 : f32
        %36 = vector.broadcast %cst_29 : f32 to vector<1x128xf32>
        %37 = arith.addf %34, %36 : vector<1x128xf32>
        %38 = math.rsqrt %37 : vector<1x128xf32>
        %39 = arith.mulf %35, %38 : vector<1x128xf32>
        %c0_30 = arith.constant 0 : index
        %c0_31 = arith.constant 0 : index
        %40 = vector.load %arg12[%c0_30, %c0_31] : memref<1x128xf32, #tpu.memory_space<vmem>>, vector<1x128xf32>
        tpu.vector_store %arg12[%c0_30, %c0_31], %39 {strides = array<i32>} : memref<1x128xf32, #tpu.memory_space<vmem>>, vector<1x128xf32>,
        %c0_32 = arith.constant 0 : index
        %c0_33 = arith.constant 0 : index
        %41 = vector.load %arg6[%c0_32, %c0_33] : memref<1x128xf32, #tpu.memory_space<vmem>>, vector<1x128xf32>
        %c0_34 = arith.constant 0 : index
        %c0_35 = arith.constant 0 : index
        %42 = vector.load %arg4[%c0_34, %c0_35] : memref<1x128xf32, #tpu.memory_space<vmem>>, vector<1x128xf32>
        %43 = arith.addf %27, %42 : vector<1x128xf32>
        %44 = arith.mulf %43, %39 : vector<1x128xf32>
        %45 = arith.subf %41, %44 : vector<1x128xf32>
        %c0_36 = arith.constant 0 : index
        %c0_37 = arith.constant 0 : index
        %46 = vector.load %arg13[%c0_36, %c0_37] : memref<1x128xf32, #tpu.memory_space<vmem>>, vector<1x128xf32>
        tpu.vector_store %arg13[%c0_36, %c0_37], %45 {strides = array<i32>} : memref<1x128xf32, #tpu.memory_space<vmem>>, vector<1x128xf32>,
      } else {
      }
    } else {
    }
    %c1_i32 = arith.constant 1 : i32
    %3 = arith.cmpi eq, %arg0, %c1_i32 : i32
    %4 = arith.extui %3 : i1 to i32
    %c0_i32_1 = arith.constant 0 : i32
    %5 = arith.cmpi ne, %4, %c0_i32_1 : i32
    scf.if %5 {
      %c0 = arith.constant 0 : index
      %c0_2 = arith.constant 0 : index
      %6 = vector.load %arg2[%c0, %c0_2] : memref<24x22xf32, #tpu.memory_space<vmem>>, vector<24x22xf32>
      %c0_3 = arith.constant 0 : index
      %c0_4 = arith.constant 0 : index
      %7 = vector.load %arg3[%c0_3, %c0_4] : memref<22x128xf32, #tpu.memory_space<vmem>>, vector<22x128xf32>
      %cst = arith.constant dense<0.000000e+00> : vector<24x128xf32>
      %8 = tpu.matmul %6, %7, %cst {dimension_numbers = #tpu.dot_dimension_numbers<[1], [0], [0], [1], [0, 0, 1, 1], [], []>} : vector<24x22xf32>, vector<22x128xf32>, vector<24x128xf32> -> vector<24x128xf32>
      %c0_5 = arith.constant 0 : index
      %c0_6 = arith.constant 0 : index
      %9 = vector.load %arg4[%c0_5, %c0_6] : memref<1x128xf32, #tpu.memory_space<vmem>>, vector<1x128xf32>
      %10 = vector.broadcast %9 : vector<1x128xf32> to vector<24x128xf32>
      %11 = arith.addf %8, %10 : vector<24x128xf32>
      %c0_7 = arith.constant 0 : index
      %c0_8 = arith.constant 0 : index
      %12 = vector.load %arg12[%c0_7, %c0_8] : memref<1x128xf32, #tpu.memory_space<vmem>>, vector<1x128xf32>
      %13 = vector.broadcast %12 : vector<1x128xf32> to vector<24x128xf32>
      %14 = arith.mulf %11, %13 : vector<24x128xf32>
      %c0_9 = arith.constant 0 : index
      %c0_10 = arith.constant 0 : index
      %15 = vector.load %arg13[%c0_9, %c0_10] : memref<1x128xf32, #tpu.memory_space<vmem>>, vector<1x128xf32>
      %16 = vector.broadcast %15 : vector<1x128xf32> to vector<24x128xf32>
      %17 = arith.addf %14, %16 : vector<24x128xf32>
      %cst_11 = arith.constant 0.000000e+00 : f32
      %18 = vector.broadcast %cst_11 : f32 to vector<24x128xf32>
      %19 = arith.cmpf ogt, %17, %18 : vector<24x128xf32>
      %cst_12 = arith.constant 2.000000e-01 : f32
      %20 = vector.broadcast %cst_12 : f32 to vector<24x128xf32>
      %21 = arith.mulf %20, %17 : vector<24x128xf32>
      %22 = arith.select %19, %17, %21 : vector<24x128xi1>, vector<24x128xf32>
      %c0_13 = arith.constant 0 : index
      %c0_14 = arith.constant 0 : index
      %23 = vector.load %arg7[%c0_13, %c0_14] : memref<128x16xf32, #tpu.memory_space<vmem>>, vector<128x16xf32>
      %cst_15 = arith.constant dense<0.000000e+00> : vector<24x16xf32>
      %24 = tpu.matmul %22, %23, %cst_15 {dimension_numbers = #tpu.dot_dimension_numbers<[1], [0], [0], [1], [0, 0, 1, 1], [], []>} : vector<24x128xf32>, vector<128x16xf32>, vector<24x16xf32> -> vector<24x16xf32>
      %c0_16 = arith.constant 0 : index
      %c0_17 = arith.constant 0 : index
      %25 = vector.load %arg8[%c0_16, %c0_17] : memref<1x16xf32, #tpu.memory_space<vmem>>, vector<1x16xf32>
      %26 = vector.broadcast %25 : vector<1x16xf32> to vector<24x16xf32>
      %27 = arith.addf %24, %26 : vector<24x16xf32>
      %c0_18 = arith.constant 0 : index
      %c0_19 = arith.constant 0 : index
      %28 = vector.load %arg9[%c0_18, %c0_19] : memref<24x16xf32, #tpu.memory_space<vmem>>, vector<24x16xf32>
      tpu.vector_store %arg9[%c0_18, %c0_19], %27 {strides = array<i32>} : memref<24x16xf32, #tpu.memory_space<vmem>>, vector<24x16xf32>,
    } else {
    }
    return
  }
  func.func @transform_0(%arg0: i32, %arg1: i32) -> (i32, i32) {
    %c0_i32 = arith.constant 0 : i32
    %c0_i32_0 = arith.constant 0 : i32
    return %arg1, %c0_i32 : i32, i32
  }
  func.func @transform_1(%arg0: i32, %arg1: i32) -> (i32, i32) {
    %c0_i32 = arith.constant 0 : i32
    %c0_i32_0 = arith.constant 0 : i32
    %c0_i32_1 = arith.constant 0 : i32
    return %c0_i32, %c0_i32_0 : i32, i32
  }
  func.func @transform_2(%arg0: i32, %arg1: i32) -> (i32, i32) {
    %c0_i32 = arith.constant 0 : i32
    %c0_i32_0 = arith.constant 0 : i32
    %c0_i32_1 = arith.constant 0 : i32
    return %c0_i32, %c0_i32_0 : i32, i32
  }
  func.func @transform_3(%arg0: i32, %arg1: i32) -> (i32, i32) {
    %c0_i32 = arith.constant 0 : i32
    %c0_i32_0 = arith.constant 0 : i32
    %c0_i32_1 = arith.constant 0 : i32
    return %c0_i32, %c0_i32_0 : i32, i32
  }
  func.func @transform_4(%arg0: i32, %arg1: i32) -> (i32, i32) {
    %c0_i32 = arith.constant 0 : i32
    %c0_i32_0 = arith.constant 0 : i32
    %c0_i32_1 = arith.constant 0 : i32
    return %c0_i32, %c0_i32_0 : i32, i32
  }
  func.func @transform_5(%arg0: i32, %arg1: i32) -> (i32, i32) {
    %c0_i32 = arith.constant 0 : i32
    %c0_i32_0 = arith.constant 0 : i32
    %c0_i32_1 = arith.constant 0 : i32
    return %c0_i32, %c0_i32_0 : i32, i32
  }
  func.func @transform_6(%arg0: i32, %arg1: i32) -> (i32, i32) {
    %c0_i32 = arith.constant 0 : i32
    %c0_i32_0 = arith.constant 0 : i32
    %c0_i32_1 = arith.constant 0 : i32
    return %c0_i32, %c0_i32_0 : i32, i32
  }
  func.func @transform_7(%arg0: i32, %arg1: i32) -> (i32, i32) {
    %0 = arith.muli %arg1, %arg0 : i32
    %c0_i32 = arith.constant 0 : i32
    %c0_i32_0 = arith.constant 0 : i32
    return %0, %c0_i32 : i32, i32
  }
}

</mosaic_0001>

<bundles_post_ra>
// kernel: edge_model_forward.1
= control target key start
LH: loop header
LB: loop body
LE: loop exit
PB: predicated region body
PF: predicated region fallthrough
CT: control target
= control target key end

     0   :  { %s1194_s24 = smov 0   ;;  %s1196_s25 = smov 0   ;;  %s1354_s0 = inlined_call_operand.vmem [shape: f32[24,22], index: 0, kind: input, shape index: {}]   ;;  %s1355_s1 = inlined_call_operand.vmem [shape: f32[22,128], index: 1, kind: input, shape index: {}]   ;;  %s1356_s2 = inlined_call_operand.vmem [shape: f32[1,128], index: 2, kind: input, shape index: {}]   ;;  %s1357_s3 = inlined_call_operand.vmem [shape: f32[1,128], index: 3, kind: input, shape index: {}]   ;;  %s1358_s4 = inlined_call_operand.vmem [shape: f32[1,128], index: 4, kind: input, shape index: {}]   ;;  %s1359_s5 = inlined_call_operand.vmem [shape: f32[128,16], index: 5, kind: input, shape index: {}]   ;;  %s1360_s6 = inlined_call_operand.vmem [shape: f32[1,16], index: 6, kind: input, shape index: {}]   ;;  %s1361_s7 = inlined_call_operand.vmem [shape: f32[24,16], index: 7, kind: output, shape index: {}]  }
   0x1   :  { %s1198_s26 = smov 0  }
   0x2 LB: > { %s29_s27 = sadd.s32 1, %s1141_s25  ;;  %p905_p0 = scmp.ge.s32.totalorder %s1145_s26, 1  ;;  %s1145_s26 = sphi %s1198_s26, %s17_s26   ;;  %s1141_s25 = sphi %s1196_s25, %s1363_s25   ;;  %s1137_s24 = sphi %s1194_s24, %s1362_s24  }
   0x3   : > { %p31_p1 = scmp.ge.s32.totalorder %s29_s27, 2  ;;  %p252_p2 = scmp.lt.s32.totalorder %s1145_s26, 3 }
   0x5   : > { %s1365_s27 = smov (%p31_p1, %s29_s27), 0  ;;  %p253_p3 = pnand %p905_p0, %p252_p2 }
   0x6   : > { %p906_p4 = scmp.ne.s32.totalorder (!%p253_p3), %s1137_s24, 0 }
   0x7   : > { %256 = sbr.rel (%p253_p3) target bundleno = 952 (0x3b8), region = 48 }
   0xe   : > { %302 = sbr.rel (%p906_p4) target bundleno = 499 (0x1f3), region = 52  ;;  %v312_v0 = vld [vmem:[%s1355_s1] sm:$0xff] (!%p906_p4)  ;;  %v313_v1 = vld [vmem:[%s1355_s1 + $0x8] sm:$0xff] (!%p906_p4)  ;;  %v1147_v2 = vmov (!%p906_p4), 0.0|0.0   ;;  %v1148_v4 = vmov (!%p906_p4), 0.0   ;;  %vm1149_vm0 = vmmov (!%p906_p4), 0  }
   0xf   : > { %1054 = vmatprep.subr.bf16.mxu0 (!%p906_p4), %v1147_v2  ;;  %v1055_v3 = vpack.c.bf16 (!%p906_p4), %v313_v1, %v312_v0  ;;  %307 = vst [vmem:[#allocation2] sm:$0x1] (!%p906_p4), %v1148_v4  ;;  %308 = vst [vmem:[#allocation3] sm:$0x1] (!%p906_p4), %v1148_v4  ;;  %1057 = vmatprep.subr.bf16.mxu1 (!%p906_p4), %v1147_v2  ;;  %v314_v5 = vld [vmem:[%s1355_s1 + $0x10] sm:$0x3f] (!%p906_p4) }
  0x10   : > { %971 = vmatprep.mubr.msk.f32.mxu0 (!%p906_p4), %vm1149_vm0, %v1148_v4  ;;  %986 = vmatprep.mubr.msk.f32.mxu1 (!%p906_p4), %vm1149_vm0, %v1148_v4  ;;  %vm325_vm1 = vcmask (!%p906_p4), 1045504   ;;  %v309_v6 = vld [vmem:[%s1354_s0] sm:$0xff] (!%p906_p4)  ;;  %vm315_vm2 = vcmask (!%p906_p4), 179200   ;;  %v310_v7 = vld [vmem:[%s1354_s0 + $0x8] sm:$0xff] (!%p906_p4)  ;;  %v311_v8 = vld [vmem:[%s1354_s0 + $0x10] sm:$0xff] (!%p906_p4)  ;;  %vm410_vm3 = vcmask (!%p906_p4), 195584  }
  0x11   : > { %1056 = vmatpush3.bf16.msra.mxu0 (!%p906_p4), %v1055_v3  ;;  %v1150_v19 = vmov (!%p906_p4), 1.0   ;;  %v578_v37 = vld [vmem:[%s1356_s2] sm:$0x1] (!%p906_p4) }
  0x12   : > { %969 = vmatprep.subr.mxu0 (!%p906_p4), %v1148_v4  ;;  %v572_v38 = vld [vmem:[%s1357_s3] sm:$0x1] (!%p906_p4) }
  0x13   : > { %v577_v42 = vld [vmem:[%s1358_s4] sm:$0x1] (!%p906_p4) }
  0x15   : > { %970 = vmatpush3.msk.msra.mxu0 %vm325_vm1, %v314_v5 }
  0x16   : > { %972 = vmatmul.mubr.msk.f32.vlgmr.msra.gmra.mrb[0].mxu0 %vm315_vm2, %v309_v6  ;;  %v409_v21 = vld [vmem:[#allocation2] sm:$0x1]  ;;  %v486_v25 = vld [vmem:[#allocation3] sm:$0x1] }
  0x17   : > { %974 = vmatprep.mubr.msk.f32.mxu0 %vm1149_vm0, %v1148_v4 }
  0x1a   : > { %975 = vmatmul.mubr.msk.f32.gmra.mrb[2].mxu0 %vm315_vm2, %v310_v7 }
  0x1b   : > { %977 = vmatprep.mubr.msk.f32.mxu0 %vm1149_vm0, %v1148_v4 }
  0x1e   : > { %978 = vmatmul.mubr.msk.f32.gmra.mrb[4].mxu0 %vm315_vm2, %v311_v8 }
  0xe9   : > { %v395_v9 = vpop.f32.mrb[0].mxu0 }
  0xea   : > { %v973_v10 = vpop.f32.mrb[1].mxu0  ;;  %v487_v12 = vmul.f32 %v395_v9, %v395_v9 }
  0xed   : > { %v400_v11 = vpop.f32.mrb[2].mxu0 }
  0xee   : > { %v488_v13 = vmul.f32 %v400_v11, %v400_v11  ;;  %v976_v14 = vpop.f32.mrb[3].mxu0  ;;  %v1058_v15 = vpack.c.bf16 %v400_v11, %v395_v9 }
  0xf0   : > { %v1061_v16 = vpack.c.bf16 %v488_v13, %v487_v12  ;;  %1059 = vmatpush3.bf16.msra.mxu1 %v1058_v15 }
  0xf1   : > { %v405_v17 = vpop.f32.mrb[4].mxu0  ;;  %984 = vmatprep.subr.mxu1 %v1148_v4 }
  0xf2   : > { %v979_v18 = vpop.f32.mrb[5].mxu0  ;;  %v489_v20 = vmul.f32 %v405_v17, %v405_v17 }
  0xf4   : > { %985 = vmatpush3.msra.mxu1 %v405_v17 }
  0xf5   : > { %987 = vmatmul.mubr.msk.f32.vlgmr.msra.gmra.mrb[0].mxu1 %vm410_vm3, %v1150_v19  ;;  %1060 = vmatprep.subr.bf16.mxu1 %v1147_v2 }
  0xf6   : > { %1062 = vmatpush3.bf16.msra.mxu1 %v1061_v16  ;;  %995 = vmatprep.mubr.msk.f32.mxu1 %vm1149_vm0, %v1148_v4 }
  0xf7   : > { %993 = vmatprep.subr.mxu1 %v1148_v4 }
  0xfa   : > { %994 = vmatpush3.msra.mxu1 %v489_v20 }
  0xfb   : > { %996 = vmatmul.mubr.msk.f32.vlgmr.msra.gmra.mrb[2].mxu1 %vm410_vm3, %v1150_v19 }
 0x1c8   : > { %v480_v22 = vpop.f32.mrb[0].mxu1 }
 0x1c9   : > { %v484_v23 = vadd.f32 %v480_v22, %v409_v21  ;;  %v988_v24 = vpop.f32.mrb[1].mxu1 }
 0x1cb   : > { %485 = vst [vmem:[#allocation2] sm:$0x1] %v484_v23 }
 0x1ce   : > { %v556_v26 = vpop.f32.mrb[2].mxu1 }
 0x1cf   : > { %v560_v27 = vadd.f32 %v556_v26, %v486_v25  ;;  %v997_v28 = vpop.f32.mrb[3].mxu1 }
 0x1d1   : > { %561 = vst [vmem:[#allocation3] sm:$0x1] %v560_v27 }
 0x1d2   : > { %v565_v29 = vld [vmem:[#allocation2] sm:$0x1] }
 0x1d3   : > { %v566_v30 = vmul.f32 0.05, %v565_v29 }
 0x1d5   : > { %v569_v32 = vmul.f32 %v566_v30, %v566_v30  ;;  %v579_v40 = vadd.f32 %v578_v37, %v566_v30 }
 0x1d8   : > { %v567_v31 = vld [vmem:[#allocation3] sm:$0x1] }
 0x1d9   : > { %v568_v33 = vmul.f32 0.05, %v567_v31 }
 0x1db   : > { %v570_v34 = vsub.f32 %v568_v33, %v569_v32 }
 0x1dd   : > { %v571_v35 = vmax.f32 %v570_v34, 0.0 }
 0x1df   : > { %v573_v36 = vadd.f32 1e-05, %v571_v35 }
 0x1e1   : > { %1121 = vrsqrt.f32 %v573_v36 }
 0x1eb   : > { %v1122_v39 = vpop.eup %1121 }
 0x1ec   : > { %v575_v41 = vmul.f32 %v1122_v39, %v572_v38 }
 0x1ee   : > { %576 = vst [vmem:[#allocation4] sm:$0x1] %v575_v41  ;;  %v580_v43 = vmul.f32 %v579_v40, %v575_v41 }
 0x1f0   : > { %v581_v44 = vsub.f32 %v577_v42, %v580_v43 }
 0x1f2   : > { %582 = vst [vmem:[#allocation5] sm:$0x1] %v581_v44 }
 0x1f3 PF: > { %p913_p5 = scmp.ne.s32.totalorder %s1137_s24, 1 }
 0x1f4   : > { %v590_v45 = vld [vmem:[%s1355_s1] sm:$0xff] (!%p913_p5)  ;;  %v591_v46 = vld [vmem:[%s1355_s1 + $0x8] sm:$0xff] (!%p913_p5)  ;;  %v1151_v47 = vmov (!%p913_p5), 0.0|0.0   ;;  %vm1152_vm4 = vmmov (!%p913_p5), 0   ;;  %v1153_v49 = vmov (!%p913_p5), 0.0   ;;  %v725_v52 = vld [vmem:[%s1359_s5 + $0x10] sm:$0xff] (!%p913_p5) }
 0x1f5   : > { %586 = sbr.rel (%p913_p5) target bundleno = 952 (0x3b8), region = 64  ;;  %1063 = vmatprep.subr.bf16.mxu0 (!%p913_p5), %v1151_v47  ;;  %v1064_v48 = vpack.c.bf16 (!%p913_p5), %v591_v46, %v590_v45  ;;  %1066 = vmatprep.subr.bf16.mxu1 (!%p913_p5), %v1151_v47  ;;  %v723_v50 = vld [vmem:[%s1359_s5] sm:$0xff] (!%p913_p5)  ;;  %v724_v51 = vld [vmem:[%s1359_s5 + $0x8] sm:$0xff] (!%p913_p5)  ;;  %v726_v54 = vld [vmem:[%s1359_s5 + $0x18] sm:$0xff] (!%p913_p5)  ;;  %vm610_vm5 = vcmask (!%p913_p5), 1045504   ;;  %vm600_vm6 = vcmask (!%p913_p5), 179200  }
 0x1f6   : > { %1004 = vmatprep.mubr.msk.f32.mxu0 (!%p913_p5), %vm1152_vm4, %v1153_v49  ;;  %1045 = vmatprep.mubr.msk.f32.mxu1 (!%p913_p5), %vm1152_vm4, %v1153_v49  ;;  %v1067_v53 = vpack.c.bf16 (!%p913_p5), %v724_v51, %v723_v50  ;;  %v592_v55 = vld [vmem:[%s1355_s1 + $0x10] sm:$0x3f] (!%p913_p5)  ;;  %v587_v56 = vld [vmem:[%s1354_s0] sm:$0xff] (!%p913_p5)  ;;  %v1070_v57 = vpack.c.bf16 (!%p913_p5), %v726_v54, %v725_v52  ;;  %v728_v59 = vld [vmem:[%s1359_s5 + $0x28] sm:$0xff] (!%p913_p5)  ;;  %vm826_vm10 = vcmask (!%p913_p5), 130048  }
 0x1f7   : > { %1065 = vmatpush3.bf16.msra.mxu0 (!%p913_p5), %v1064_v48  ;;  %v727_v58 = vld [vmem:[%s1359_s5 + $0x20] sm:$0xff] (!%p913_p5)  ;;  %v588_v60 = vld [vmem:[%s1354_s0 + $0x8] sm:$0xff] (!%p913_p5)  ;;  %v729_v62 = vld [vmem:[%s1359_s5 + $0x30] sm:$0xff] (!%p913_p5) }
 0x1f8   : > { %1002 = vmatprep.subr.mxu0 (!%p913_p5), %v1153_v49  ;;  %1068 = vmatpush3.bf16.msra.mxu1 (!%p913_p5), %v1067_v53  ;;  %v1073_v61 = vpack.c.bf16 (!%p913_p5), %v728_v59, %v727_v58  ;;  %v730_v63 = vld [vmem:[%s1359_s5 + $0x38] sm:$0xff] (!%p913_p5)  ;;  %v589_v0 = vld [vmem:[%s1354_s0 + $0x10] sm:$0xff] (!%p913_p5)  ;;  %v731_v2 = vld [vmem:[%s1359_s5 + $0x40] sm:$0xff] (!%p913_p5) }
 0x1f9   : > { %1069 = vmatprep.subr.bf16.mxu1 (!%p913_p5), %v1151_v47  ;;  %v1076_v1 = vpack.c.bf16 (!%p913_p5), %v730_v63, %v729_v62  ;;  %v732_v3 = vld [vmem:[%s1359_s5 + $0x48] sm:$0xff] (!%p913_p5)  ;;  %v733_v5 = vld [vmem:[%s1359_s5 + $0x50] sm:$0xff] (!%p913_p5)  ;;  %v734_v6 = vld [vmem:[%s1359_s5 + $0x58] sm:$0xff] (!%p913_p5) }
 0x1fa   : > { %v1079_v4 = vpack.c.bf16 (!%p913_p5), %v732_v3, %v731_v2  ;;  %v1082_v7 = vpack.c.bf16 (!%p913_p5), %v734_v6, %v733_v5  ;;  %v735_v8 = vld [vmem:[%s1359_s5 + $0x60] sm:$0xff] (!%p913_p5)  ;;  %v736_v9 = vld [vmem:[%s1359_s5 + $0x68] sm:$0xff] (!%p913_p5)  ;;  %v737_v11 = vld [vmem:[%s1359_s5 + $0x70] sm:$0xff] (!%p913_p5) }
 0x1fb   : > { %1003 = vmatpush3.msk.msra.mxu0 (!%p913_p5), %vm610_vm5, %v592_v55  ;;  %v1085_v10 = vpack.c.bf16 (!%p913_p5), %v736_v9, %v735_v8  ;;  %v738_v12 = vld [vmem:[%s1359_s5 + $0x78] sm:$0xff] (!%p913_p5)  ;;  %v914_v14 = vld [vmem:[%s1356_s2] ss:$0 sm:$0xff] (!%p913_p5)  ;;  %v919_v16 = vld [vmem:[#allocation4] ss:$0 sm:$0xff] (!%p913_p5) }
 0x1fc   : > { %1005 = vmatmul.mubr.msk.f32.vlgmr.msra.gmra.mrb[0].mxu0 %vm600_vm6, %v587_v56  ;;  %1071 = vmatpush3.bf16.msra.mxu1 %v1070_v57  ;;  %v1088_v13 = vpack.c.bf16 %v738_v12, %v737_v11  ;;  %v920_v19 = vld [vmem:[#allocation5] ss:$0 sm:$0xff]  ;;  %v921_v38 = vld [vmem:[%s1360_s6] ss:$0 sm:$0xff] }
 0x1fd   : > { %1007 = vmatprep.mubr.msk.f32.mxu0 %vm1152_vm4, %v1153_v49  ;;  %1072 = vmatprep.subr.bf16.mxu1 %v1151_v47 }
 0x200   : > { %1008 = vmatmul.mubr.msk.f32.gmra.mrb[2].mxu0 %vm600_vm6, %v588_v60  ;;  %1074 = vmatpush3.bf16.msra.mxu1 %v1073_v61 }
 0x201   : > { %1010 = vmatprep.mubr.msk.f32.mxu0 %vm1152_vm4, %v1153_v49  ;;  %1075 = vmatprep.subr.bf16.mxu1 %v1151_v47 }
 0x204   : > { %1011 = vmatmul.mubr.msk.f32.gmra.mrb[4].mxu0 %vm600_vm6, %v589_v0  ;;  %1077 = vmatpush3.bf16.msra.mxu1 %v1076_v1 }
 0x205   : > { %1078 = vmatprep.subr.bf16.mxu1 %v1151_v47 }
 0x208   : > { %1080 = vmatpush3.bf16.msra.mxu1 %v1079_v4 }
 0x209   : > { %1081 = vmatprep.subr.bf16.mxu1 %v1151_v47 }
 0x20c   : > { %1083 = vmatpush3.bf16.msra.mxu1 %v1082_v7 }
 0x20d   : > { %1084 = vmatprep.subr.bf16.mxu1 %v1151_v47 }
 0x210   : > { %1086 = vmatpush3.bf16.msra.mxu1 %v1085_v10 }
 0x211   : > { %1087 = vmatprep.subr.bf16.mxu1 %v1151_v47 }
 0x214   : > { %1089 = vmatpush3.bf16.msra.mxu1 %v1088_v13 }
 0x2cf   : > { %v680_v15 = vpop.f32.mrb[0].mxu0 }
 0x2d0   : > { %v681_v17 = vadd.f32 %v914_v14, %v680_v15  ;;  %v1006_v18 = vpop.f32.mrb[1].mxu0 }
 0x2d2   : > { %v701_v20 = vmul.f32 %v919_v16, %v681_v17 }
 0x2d3   : > { %v685_v21 = vpop.f32.mrb[2].mxu0 }
 0x2d4   : > { %v711_v22 = vadd.f32 %v920_v19, %v701_v20  ;;  %v686_v23 = vadd.f32 %v914_v14, %v685_v21  ;;  %v1009_v24 = vpop.f32.mrb[3].mxu0 }
 0x2d6   : > { %v702_v25 = vmul.f32 %v919_v16, %v686_v23  ;;  %vm714_vm7 = vcmp.gt.f32.partialorder %v711_v22, 0.0  ;;  %v717_v26 = vmul.f32 0.2, %v711_v22 }
 0x2d7   : > { %v690_v27 = vpop.f32.mrb[4].mxu0 }
 0x2d8   : > { %v712_v28 = vadd.f32 %v920_v19, %v702_v25  ;;  %v691_v29 = vadd.f32 %v914_v14, %v690_v27  ;;  %v1012_v30 = vpop.f32.mrb[5].mxu0  ;;  %v720_v31 = vsel %vm714_vm7, %v711_v22, %v717_v26 }
 0x2d9   : > { %1046 = vmatmul.mubr.f32.vlgmr.msra.gmra.mrb[0].mxu1 %v720_v31 }
 0x2da   : > { %v703_v32 = vmul.f32 %v919_v16, %v691_v29  ;;  %1048 = vmatprep.mubr.msk.f32.mxu1 %vm1152_vm4, %v1153_v49  ;;  %vm715_vm8 = vcmp.gt.f32.partialorder %v712_v28, 0.0  ;;  %v718_v33 = vmul.f32 0.2, %v712_v28 }
 0x2dc   : > { %v713_v34 = vadd.f32 %v920_v19, %v703_v32  ;;  %v721_v35 = vsel %vm715_vm8, %v712_v28, %v718_v33 }
 0x2dd   : > { %1049 = vmatmul.mubr.f32.gmra.mrb[2].mxu1 %v721_v35 }
 0x2de   : > { %1051 = vmatprep.mubr.msk.f32.mxu1 %vm1152_vm4, %v1153_v49  ;;  %vm716_vm9 = vcmp.gt.f32.partialorder %v713_v34, 0.0  ;;  %v719_v36 = vmul.f32 0.2, %v713_v34 }
 0x2e0   : > { %v722_v37 = vsel %vm716_vm9, %v713_v34, %v719_v36 }
 0x2e1   : > { %1052 = vmatmul.mubr.f32.gmra.mrb[4].mxu1 %v722_v37 }
 0x3ac   : > { %v812_v39 = vpop.f32.mrb[0].mxu1 }
 0x3ad   : > { %v813_v40 = vadd.f32 %v921_v38, %v812_v39  ;;  %v1047_v41 = vpop.f32.mrb[1].mxu1 }
 0x3af   : > { %827 = vst.msk [vmem:[%s1361_s7] sm:$0xff] %vm826_vm10, %v813_v40 }
 0x3b0   : > { %v817_v42 = vpop.f32.mrb[2].mxu1 }
 0x3b1   : > { %v818_v43 = vadd.f32 %v921_v38, %v817_v42  ;;  %v1050_v44 = vpop.f32.mrb[3].mxu1 }
 0x3b3   : > { %828 = vst.msk [vmem:[%s1361_s7 + $0x8] sm:$0xff] %vm826_vm10, %v818_v43 }
 0x3b4   : > { %v822_v45 = vpop.f32.mrb[4].mxu1 }
 0x3b5   : > { %v823_v46 = vadd.f32 %v921_v38, %v822_v45  ;;  %v1053_v47 = vpop.f32.mrb[5].mxu1 }
 0x3b7   : > { %829 = vst.msk [vmem:[%s1361_s7 + $0x10] sm:$0xff] %vm826_vm10, %v823_v46 }
 0x3b8 PF: > { %s17_s26 = sadd.s32 1, %s1145_s26   ;;  %s1362_s24 = smov %s1141_s25 }
 0x3b9   : > { %p14_p6 = scmp.ge.s32.totalorder %s17_s26, 4   ;;  %s1363_s25 = smov %s1365_s27 }
 0x3bb   :  { %16 = sbr.rel (!%p14_p6) target bundleno = 2 (0x2), region = 94 }

</bundles_post_ra>
